<compile_context>
chip_gen: v6e
topology: v6e:2x2x1
jax: 0.10.0
libtpu: 0.0.40
codegen_flags: <defaults>
</compile_context>

<pallas_src>
import functools

import jax
import jax.numpy as jnp
from jax import lax
from jax.experimental import pallas as pl
from jax.experimental.pallas import tpu as pltpu


# (m, k) x (n, k) -> (m, n): contract the LAST dims of both operands
# (== a @ b.T without materializing a transpose)
_NT = (((1,), (1,)), ((), ()))


# ------------------------------ fused kernel --------------------------------

def _mha_fused_kernel(xq_ref, xk_ref, xv_ref,
                      wq_ref, wk_ref, wv_ref, wo_ref,
                      bq_ref, bk_ref, bv_ref, bo_ref,
                      o_ref, *, num_head):
    seq = xq_ref.shape[1]
    hidden = xq_ref.shape[2]
    head_dim = hidden // num_head

    xq = xq_ref[0]                                   # (seq, hidden) bf16
    xk = xk_ref[0]
    xv = xv_ref[0]

    # ---- Q/K/V projections, computed TRANSPOSED: (W @ x^T) + b -> (hidden, seq)
    # Transposed layout puts the head axis on sublanes, so the head split below
    # is a tile-aligned (free) reshape instead of a lane-splitting relayout.
    def proj_t(x, w_ref, b_ref):
        y = lax.dot_general(w_ref[...], x, _NT,          # bf16 x bf16 -> f32 acc
                            preferred_element_type=jnp.float32)
        return y + b_ref[...]                            # bias (hidden, 1), f32

    qt = proj_t(xq, wq_ref, bq_ref)                      # (hidden, seq) f32
    kt = proj_t(xk, wk_ref, bk_ref)
    vt = proj_t(xv, wv_ref, bv_ref)

    # ---- split heads on the sublane axis (tile-aligned reshape, f32 tile = 8)
    qt = qt.reshape(num_head, head_dim, seq)             # (H, D, S)
    kt = kt.reshape(num_head, head_dim, seq)             # (H, D, S)
    vt = vt.reshape(num_head, head_dim, seq)             # (H, D, S)

    # Q needs (H, S, D) for the canonical score contraction; one small batched
    # last-two-dims transpose (tiny XLU work), done in f32 then cast for MXU.
    qh = jnp.transpose(qt, (0, 2, 1)).astype(jnp.bfloat16)   # (H, S, D) bf16
    kt = kt.astype(jnp.bfloat16)                              # (H, D, S) bf16
    vt = vt.astype(jnp.bfloat16)                              # (H, D, S) bf16

    # ---- attention scores: one head-batched MXU contraction --------------
    # s[h, q, k] = sum_d qh[h, q, d] * kt[h, d, k]
    # NO 1/sqrt(head_dim) scaling -- matches the PyTorch module.
    s = lax.dot_general(qh, kt, (((2,), (1,)), ((0,), (0,))),
                        preferred_element_type=jnp.float32)   # (H, S, S) f32

    # exact softmax over the key axis (training-named module: no approx recip)
    s = s - jnp.max(s, axis=-1, keepdims=True)
    p = jnp.exp(s)
    p = p / jnp.sum(p, axis=-1, keepdims=True)
    # dropout(p=0.1) is identity in eval mode.

    # ---- P @ V, head-batched; result comes out head-major on sublanes -----
    # r[h, d, q] = sum_k vt[h, d, k] * p[h, q, k]
    r = lax.dot_general(vt, p.astype(jnp.bfloat16),
                        (((2,), (2,)), ((0,), (0,))),
                        preferred_element_type=jnp.float32)   # (H, D, S) f32

    # ---- merge heads (free reshape) + one small 2-D transpose -------------
    merged = jnp.transpose(r.reshape(hidden, seq), (1, 0))    # (S, hidden) f32

    # ---- output projection, stored lane-dense in (bs, seq, hidden) --------
    out = lax.dot_general(merged.astype(jnp.bfloat16), wo_ref[...], _NT,
                          preferred_element_type=jnp.float32) + bo_ref[...]
    o_ref[0] = out.astype(o_ref.dtype)


# ------------------------------ host wrapper ---------------------------------

def multihead_attention(srcQ, srcK, srcV, params, num_head):
    bs, seq, hidden = srcQ.shape
    assert hidden % num_head == 0
    head_dim = hidden // num_head
    # Sublane-aligned head split (f32 sublane tile = 8).
    # TODO(synk): pad head_dim or fall back to lane slicing if not a multiple of 8.
    assert head_dim % 8 == 0, "head_dim must be a multiple of 8"

    bf16 = jnp.bfloat16

    act_spec = lambda: pl.BlockSpec((1, seq, hidden), lambda b: (b, 0, 0))
    w_spec = lambda: pl.BlockSpec((hidden, hidden), lambda b: (0, 0))   # VMEM-resident
    bT_spec = lambda: pl.BlockSpec((hidden, 1), lambda b: (0, 0))       # VMEM-resident
    bo_spec = pl.BlockSpec((1, hidden), lambda b: (0, 0))               # VMEM-resident

    kernel = functools.partial(_mha_fused_kernel, num_head=num_head)

    return pl.pallas_call(
        kernel,
        out_shape=jax.ShapeDtypeStruct((bs, seq, hidden), srcQ.dtype),
        grid=(bs,),
        in_specs=[act_spec(), act_spec(), act_spec(),
                  w_spec(), w_spec(), w_spec(), w_spec(),
                  bT_spec(), bT_spec(), bT_spec(), bo_spec],
        out_specs=pl.BlockSpec((1, seq, hidden), lambda b: (b, 0, 0)),
        compiler_params=pltpu.CompilerParams(
            dimension_semantics=("parallel",),        # 2-TC batch split on v7x
            vmem_limit_bytes=32 * 1024 * 1024),       # > v5e's 16 MiB default
    )(srcQ.astype(bf16), srcK.astype(bf16), srcV.astype(bf16),
      params["wq"].astype(bf16), params["wk"].astype(bf16),
      params["wv"].astype(bf16), params["wo"].astype(bf16),
      params["bq"].reshape(hidden, 1).astype(jnp.float32),
      params["bk"].reshape(hidden, 1).astype(jnp.float32),
      params["bv"].reshape(hidden, 1).astype(jnp.float32),
      params["bo"].reshape(1, hidden).astype(jnp.float32))


# ------------------------------ reference (JAX) ------------------------------

def multihead_attention_ref(srcQ, srcK, srcV, params, num_head):
    bs, seq, hidden = srcQ.shape
    head_dim = hidden // num_head
    lin = lambda x, w, b: x @ w.T + b
    Q = lin(srcQ, params["wq"], params["bq"])
    K = lin(srcK, params["wk"], params["bk"])
    V = lin(srcV, params["wv"], params["bv"])
    sh = lambda x: x.reshape(bs, seq, num_head, head_dim).transpose(0, 2, 1, 3)
    Q, K, V = sh(Q), sh(K), sh(V)
    s = jnp.einsum("bhqd,bhkd->bhqk", Q, K)          # NO 1/sqrt(d) scaling
    p = jax.nn.softmax(s, axis=-1)
    r = jnp.einsum("bhqk,bhkd->bhqd", p, V)
    r = r.transpose(0, 2, 1, 3).reshape(bs, seq, hidden)
    return lin(r, params["wo"], params["bo"])


# ----------------------------------- main ------------------------------------

if __name__ == "__main__":
    bs, seq, hidden, num_head = 2, 8, 32, 4

    key = jax.random.PRNGKey(0)
    ks = jax.random.split(key, 12)

    def init_w(k, shape):
        return 0.02 * jax.random.normal(k, shape, dtype=jnp.float32)

    params = {
        "wq": init_w(ks[0], (hidden, hidden)), "bq": init_w(ks[1], (hidden,)),
        "wk": init_w(ks[2], (hidden, hidden)), "bk": init_w(ks[3], (hidden,)),
        "wv": init_w(ks[4], (hidden, hidden)), "bv": init_w(ks[5], (hidden,)),
        "wo": init_w(ks[6], (hidden, hidden)), "bo": init_w(ks[7], (hidden,)),
    }

    srcQ = jax.random.normal(ks[8], (bs, seq, hidden), dtype=jnp.float32)
    srcK = jax.random.normal(ks[9], (bs, seq, hidden), dtype=jnp.float32)
    srcV = jax.random.normal(ks[10], (bs, seq, hidden), dtype=jnp.float32)

    out = multihead_attention(srcQ, srcK, srcV, params, num_head)
    out = jax.block_until_ready(out)

    ref = multihead_attention_ref(srcQ, srcK, srcV, params, num_head)
    assert out.shape == (bs, seq, hidden)
    # tolerance accounts for bf16 MXU operands (f32 accumulation) in the kernel
    assert jnp.allclose(out, ref, atol=1e-2, rtol=1e-2), "mismatch vs reference"

    print("KERNEL_OK")
</pallas_src>

<mosaic_0001>
module attributes {stable_mosaic.version = 11 : i64} {
  func.func @_mha_fused_kernel(%arg0: i32, %arg1: memref<1x8x32xbf16, #tpu.memory_space<vmem>>, %arg2: memref<1x8x32xbf16, #tpu.memory_space<vmem>>, %arg3: memref<1x8x32xbf16, #tpu.memory_space<vmem>>, %arg4: memref<32x32xbf16, #tpu.memory_space<vmem>>, %arg5: memref<32x32xbf16, #tpu.memory_space<vmem>>, %arg6: memref<32x32xbf16, #tpu.memory_space<vmem>>, %arg7: memref<32x32xbf16, #tpu.memory_space<vmem>>, %arg8: memref<32x1xf32, #tpu.memory_space<vmem>>, %arg9: memref<32x1xf32, #tpu.memory_space<vmem>>, %arg10: memref<32x1xf32, #tpu.memory_space<vmem>>, %arg11: memref<1x32xf32, #tpu.memory_space<vmem>>, %arg12: memref<1x8x32xf32, #tpu.memory_space<vmem>>) attributes {dimension_semantics = [#tpu.dimension_semantics<parallel>], iteration_bounds = array<i64: 2>, scalar_prefetch = 0 : i64, scratch_operands = 0 : i64, tpu.core_type = #tpu.core_type<tc>, window_params = [{transform_indices = @transform_0, window_bounds = array<i64: 1, 8, 32>}, {transform_indices = @transform_1, window_bounds = array<i64: 1, 8, 32>}, {transform_indices = @transform_2, window_bounds = array<i64: 1, 8, 32>}, {pipeline_mode = #tpu.pipeline_mode<synchronous>, transform_indices = @transform_3, window_bounds = array<i64: 32, 32>}, {pipeline_mode = #tpu.pipeline_mode<synchronous>, transform_indices = @transform_4, window_bounds = array<i64: 32, 32>}, {pipeline_mode = #tpu.pipeline_mode<synchronous>, transform_indices = @transform_5, window_bounds = array<i64: 32, 32>}, {pipeline_mode = #tpu.pipeline_mode<synchronous>, transform_indices = @transform_6, window_bounds = array<i64: 32, 32>}, {pipeline_mode = #tpu.pipeline_mode<synchronous>, transform_indices = @transform_7, window_bounds = array<i64: 32, 1>}, {pipeline_mode = #tpu.pipeline_mode<synchronous>, transform_indices = @transform_8, window_bounds = array<i64: 32, 1>}, {pipeline_mode = #tpu.pipeline_mode<synchronous>, transform_indices = @transform_9, window_bounds = array<i64: 32, 1>}, {pipeline_mode = #tpu.pipeline_mode<synchronous>, transform_indices = @transform_10, window_bounds = array<i64: 1, 32>}, {transform_indices = @transform_11, window_bounds = array<i64: 1, 8, 32>}]} {
    %c0 = arith.constant 0 : index
    %c0_0 = arith.constant 0 : index
    %c0_1 = arith.constant 0 : index
    %0 = vector.load %arg1[%c0, %c0_0, %c0_1] : memref<1x8x32xbf16, #tpu.memory_space<vmem>>, vector<1x8x32xbf16>
    %1 = vector.shape_cast %0 : vector<1x8x32xbf16> to vector<8x32xbf16>
    %c0_2 = arith.constant 0 : index
    %c0_3 = arith.constant 0 : index
    %c0_4 = arith.constant 0 : index
    %2 = vector.load %arg2[%c0_2, %c0_3, %c0_4] : memref<1x8x32xbf16, #tpu.memory_space<vmem>>, vector<1x8x32xbf16>
    %3 = vector.shape_cast %2 : vector<1x8x32xbf16> to vector<8x32xbf16>
    %c0_5 = arith.constant 0 : index
    %c0_6 = arith.constant 0 : index
    %c0_7 = arith.constant 0 : index
    %4 = vector.load %arg3[%c0_5, %c0_6, %c0_7] : memref<1x8x32xbf16, #tpu.memory_space<vmem>>, vector<1x8x32xbf16>
    %5 = vector.shape_cast %4 : vector<1x8x32xbf16> to vector<8x32xbf16>
    %c0_8 = arith.constant 0 : index
    %c0_9 = arith.constant 0 : index
    %6 = vector.load %arg4[%c0_8, %c0_9] : memref<32x32xbf16, #tpu.memory_space<vmem>>, vector<32x32xbf16>
    %cst = arith.constant dense<0.000000e+00> : vector<32x8xf32>
    %7 = tpu.matmul %6, %1, %cst {dimension_numbers = #tpu.dot_dimension_numbers<[1], [1], [0], [0], [0, 0, 1, 0], [], []>} : vector<32x32xbf16>, vector<8x32xbf16>, vector<32x8xf32> -> vector<32x8xf32>
    %c0_10 = arith.constant 0 : index
    %c0_11 = arith.constant 0 : index
    %8 = vector.load %arg8[%c0_10, %c0_11] : memref<32x1xf32, #tpu.memory_space<vmem>>, vector<32x1xf32>
    %9 = vector.broadcast %8 : vector<32x1xf32> to vector<32x8xf32>
    %10 = arith.addf %7, %9 : vector<32x8xf32>
    %c0_12 = arith.constant 0 : index
    %c0_13 = arith.constant 0 : index
    %11 = vector.load %arg5[%c0_12, %c0_13] : memref<32x32xbf16, #tpu.memory_space<vmem>>, vector<32x32xbf16>
    %cst_14 = arith.constant dense<0.000000e+00> : vector<32x8xf32>
    %12 = tpu.matmul %11, %3, %cst_14 {dimension_numbers = #tpu.dot_dimension_numbers<[1], [1], [0], [0], [0, 0, 1, 0], [], []>} : vector<32x32xbf16>, vector<8x32xbf16>, vector<32x8xf32> -> vector<32x8xf32>
    %c0_15 = arith.constant 0 : index
    %c0_16 = arith.constant 0 : index
    %13 = vector.load %arg9[%c0_15, %c0_16] : memref<32x1xf32, #tpu.memory_space<vmem>>, vector<32x1xf32>
    %14 = vector.broadcast %13 : vector<32x1xf32> to vector<32x8xf32>
    %15 = arith.addf %12, %14 : vector<32x8xf32>
    %c0_17 = arith.constant 0 : index
    %c0_18 = arith.constant 0 : index
    %16 = vector.load %arg6[%c0_17, %c0_18] : memref<32x32xbf16, #tpu.memory_space<vmem>>, vector<32x32xbf16>
    %cst_19 = arith.constant dense<0.000000e+00> : vector<32x8xf32>
    %17 = tpu.matmul %16, %5, %cst_19 {dimension_numbers = #tpu.dot_dimension_numbers<[1], [1], [0], [0], [0, 0, 1, 0], [], []>} : vector<32x32xbf16>, vector<8x32xbf16>, vector<32x8xf32> -> vector<32x8xf32>
    %c0_20 = arith.constant 0 : index
    %c0_21 = arith.constant 0 : index
    %18 = vector.load %arg10[%c0_20, %c0_21] : memref<32x1xf32, #tpu.memory_space<vmem>>, vector<32x1xf32>
    %19 = vector.broadcast %18 : vector<32x1xf32> to vector<32x8xf32>
    %20 = arith.addf %17, %19 : vector<32x8xf32>
    %21 = vector.shape_cast %10 : vector<32x8xf32> to vector<4x8x8xf32>
    %22 = vector.shape_cast %15 : vector<32x8xf32> to vector<4x8x8xf32>
    %23 = vector.shape_cast %20 : vector<32x8xf32> to vector<4x8x8xf32>
    %24 = tpu.transpose %21, [0, 2, 1] : vector<4x8x8xf32> -> vector<4x8x8xf32>
    %25 = arith.truncf %24 : vector<4x8x8xf32> to vector<4x8x8xbf16>
    %26 = arith.truncf %22 : vector<4x8x8xf32> to vector<4x8x8xbf16>
    %27 = arith.truncf %23 : vector<4x8x8xf32> to vector<4x8x8xbf16>
    %cst_22 = arith.constant dense<0.000000e+00> : vector<4x8x8xf32>
    %28 = tpu.matmul %25, %26, %cst_22 {dimension_numbers = #tpu.dot_dimension_numbers<[2], [1], [1], [2], [0, 0, 0, 1, 1, 2], [0], [0]>} : vector<4x8x8xbf16>, vector<4x8x8xbf16>, vector<4x8x8xf32> -> vector<4x8x8xf32>
    %cst_23 = arith.constant dense<0xFF800000> : vector<4x8xf32>
    %29 = vector.multi_reduction <maximumf>, %28, %cst_23 [2] : vector<4x8x8xf32> to vector<4x8xf32>
    %30 = vector.shape_cast %29 : vector<4x8xf32> to vector<4x8x1xf32>
    %31 = vector.broadcast %30 : vector<4x8x1xf32> to vector<4x8x8xf32>
    %32 = arith.subf %28, %31 : vector<4x8x8xf32>
    %33 = math.exp %32 : vector<4x8x8xf32>
    %cst_24 = arith.constant dense<0.000000e+00> : vector<4x8xf32>
    %34 = vector.multi_reduction <add>, %33, %cst_24 [2] : vector<4x8x8xf32> to vector<4x8xf32>
    %35 = vector.shape_cast %34 : vector<4x8xf32> to vector<4x8x1xf32>
    %36 = vector.broadcast %35 : vector<4x8x1xf32> to vector<4x8x8xf32>
    %37 = arith.divf %33, %36 : vector<4x8x8xf32>
    %38 = arith.truncf %37 : vector<4x8x8xf32> to vector<4x8x8xbf16>
    %cst_25 = arith.constant dense<0.000000e+00> : vector<4x8x8xf32>
    %39 = tpu.matmul %27, %38, %cst_25 {dimension_numbers = #tpu.dot_dimension_numbers<[2], [2], [1], [1], [0, 0, 0, 1, 1, 1], [0], [0]>} : vector<4x8x8xbf16>, vector<4x8x8xbf16>, vector<4x8x8xf32> -> vector<4x8x8xf32>
    %40 = vector.shape_cast %39 : vector<4x8x8xf32> to vector<32x8xf32>
    %41 = tpu.transpose %40, [1, 0] : vector<32x8xf32> -> vector<8x32xf32>
    %42 = arith.truncf %41 : vector<8x32xf32> to vector<8x32xbf16>
    %c0_26 = arith.constant 0 : index
    %c0_27 = arith.constant 0 : index
    %43 = vector.load %arg7[%c0_26, %c0_27] : memref<32x32xbf16, #tpu.memory_space<vmem>>, vector<32x32xbf16>
    %cst_28 = arith.constant dense<0.000000e+00> : vector<8x32xf32>
    %44 = tpu.matmul %42, %43, %cst_28 {dimension_numbers = #tpu.dot_dimension_numbers<[1], [1], [0], [0], [0, 0, 1, 0], [], []>} : vector<8x32xbf16>, vector<32x32xbf16>, vector<8x32xf32> -> vector<8x32xf32>
    %c0_29 = arith.constant 0 : index
    %c0_30 = arith.constant 0 : index
    %45 = vector.load %arg11[%c0_29, %c0_30] : memref<1x32xf32, #tpu.memory_space<vmem>>, vector<1x32xf32>
    %46 = vector.broadcast %45 : vector<1x32xf32> to vector<8x32xf32>
    %47 = arith.addf %44, %46 : vector<8x32xf32>
    %c0_31 = arith.constant 0 : index
    %c0_32 = arith.constant 0 : index
    %c0_33 = arith.constant 0 : index
    %48 = vector.load %arg12[%c0_31, %c0_32, %c0_33] : memref<1x8x32xf32, #tpu.memory_space<vmem>>, vector<1x8x32xf32>
    %49 = vector.shape_cast %48 : vector<1x8x32xf32> to vector<8x32xf32>
    %50 = vector.shape_cast %47 : vector<8x32xf32> to vector<1x8x32xf32>
    tpu.vector_store %arg12[%c0_31, %c0_32, %c0_33], %50 {strides = array<i32>} : memref<1x8x32xf32, #tpu.memory_space<vmem>>, vector<1x8x32xf32>,
    return
  }
  func.func @transform_0(%arg0: i32) -> (i32, i32, i32) {
    %c0_i32 = arith.constant 0 : i32
    %c0_i32_0 = arith.constant 0 : i32
    %c0_i32_1 = arith.constant 0 : i32
    return %arg0, %c0_i32, %c0_i32_0 : i32, i32, i32
  }
  func.func @transform_1(%arg0: i32) -> (i32, i32, i32) {
    %c0_i32 = arith.constant 0 : i32
    %c0_i32_0 = arith.constant 0 : i32
    %c0_i32_1 = arith.constant 0 : i32
    return %arg0, %c0_i32, %c0_i32_0 : i32, i32, i32
  }
  func.func @transform_2(%arg0: i32) -> (i32, i32, i32) {
    %c0_i32 = arith.constant 0 : i32
    %c0_i32_0 = arith.constant 0 : i32
    %c0_i32_1 = arith.constant 0 : i32
    return %arg0, %c0_i32, %c0_i32_0 : i32, i32, i32
  }
  func.func @transform_3(%arg0: i32) -> (i32, i32) {
    %c0_i32 = arith.constant 0 : i32
    %c0_i32_0 = arith.constant 0 : i32
    %c0_i32_1 = arith.constant 0 : i32
    return %c0_i32, %c0_i32_0 : i32, i32
  }
  func.func @transform_4(%arg0: i32) -> (i32, i32) {
    %c0_i32 = arith.constant 0 : i32
    %c0_i32_0 = arith.constant 0 : i32
    %c0_i32_1 = arith.constant 0 : i32
    return %c0_i32, %c0_i32_0 : i32, i32
  }
  func.func @transform_5(%arg0: i32) -> (i32, i32) {
    %c0_i32 = arith.constant 0 : i32
    %c0_i32_0 = arith.constant 0 : i32
    %c0_i32_1 = arith.constant 0 : i32
    return %c0_i32, %c0_i32_0 : i32, i32
  }
  func.func @transform_6(%arg0: i32) -> (i32, i32) {
    %c0_i32 = arith.constant 0 : i32
    %c0_i32_0 = arith.constant 0 : i32
    %c0_i32_1 = arith.constant 0 : i32
    return %c0_i32, %c0_i32_0 : i32, i32
  }
  func.func @transform_7(%arg0: i32) -> (i32, i32) {
    %c0_i32 = arith.constant 0 : i32
    %c0_i32_0 = arith.constant 0 : i32
    %c0_i32_1 = arith.constant 0 : i32
    return %c0_i32, %c0_i32_0 : i32, i32
  }
  func.func @transform_8(%arg0: i32) -> (i32, i32) {
    %c0_i32 = arith.constant 0 : i32
    %c0_i32_0 = arith.constant 0 : i32
    %c0_i32_1 = arith.constant 0 : i32
    return %c0_i32, %c0_i32_0 : i32, i32
  }
  func.func @transform_9(%arg0: i32) -> (i32, i32) {
    %c0_i32 = arith.constant 0 : i32
    %c0_i32_0 = arith.constant 0 : i32
    %c0_i32_1 = arith.constant 0 : i32
    return %c0_i32, %c0_i32_0 : i32, i32
  }
  func.func @transform_10(%arg0: i32) -> (i32, i32) {
    %c0_i32 = arith.constant 0 : i32
    %c0_i32_0 = arith.constant 0 : i32
    %c0_i32_1 = arith.constant 0 : i32
    return %c0_i32, %c0_i32_0 : i32, i32
  }
  func.func @transform_11(%arg0: i32) -> (i32, i32, i32) {
    %c0_i32 = arith.constant 0 : i32
    %c0_i32_0 = arith.constant 0 : i32
    %c0_i32_1 = arith.constant 0 : i32
    return %arg0, %c0_i32, %c0_i32_0 : i32, i32, i32
  }
}

</mosaic_0001>

<bundles_post_ra>
// kernel: tpu_custom_call.1
= control target key start
LH: loop header
LB: loop body
LE: loop exit
PB: predicated region body
PF: predicated region fallthrough
CT: control target
= control target key end

     0   :  { %16 = vsyncpa [#allocation3], 0  ;;  %s2056_s0 = inlined_call_operand.vmem [shape: bf16[2,8,32], index: 0, kind: input, shape index: {}]   ;;  %s2057_s1 = inlined_call_operand.vmem [shape: bf16[2,8,32], index: 1, kind: input, shape index: {}]   ;;  %s2058_s2 = inlined_call_operand.vmem [shape: bf16[2,8,32], index: 2, kind: input, shape index: {}]   ;;  %s2059_s3 = inlined_call_operand.vmem [shape: bf16[32,32], index: 3, kind: input, shape index: {}]   ;;  %s2060_s4 = inlined_call_operand.vmem [shape: bf16[32,32], index: 4, kind: input, shape index: {}]   ;;  %s2061_s5 = inlined_call_operand.vmem [shape: bf16[32,32], index: 5, kind: input, shape index: {}]   ;;  %s2062_s6 = inlined_call_operand.vmem [shape: bf16[32,32], index: 6, kind: input, shape index: {}]   ;;  %s2063_s7 = inlined_call_operand.vmem [shape: f32[32,1], index: 7, kind: input, shape index: {}]   ;;  %s2064_s8 = inlined_call_operand.vmem [shape: f32[32,1], index: 8, kind: input, shape index: {}]   ;;  %s2065_s9 = inlined_call_operand.vmem [shape: f32[32,1], index: 9, kind: input, shape index: {}]   ;;  %s2066_s10 = inlined_call_operand.vmem [shape: f32[1,32], index: 10, kind: input, shape index: {}]   ;;  %s2067_s11 = inlined_call_operand.hbm [shape: f32[2,8,32], index: 11, kind: output, shape index: {}]  }
   0x1   :  { %18 = vsyncpa [#allocation3 + $0x1], 0  ;;  %s1803_s17 = smov 0   ;;  %s1805_s18 = smov 0  }
   0x2   :  { %s1807_s19 = smov 0   ;;  %s1809_s20 = smov 0  }
   0x3 LB: > { %2071 = sst [smem:[#allocation5_spill]] %s1733_s19  ;;  %s1824_s21 = sadd.s32 4294967295, %s1737_s20   ;;  %s1737_s20 = sphi %s1809_s20, %s2076_s20   ;;  %s1733_s19 = sphi %s1807_s19, %s2078_s19   ;;  %s1729_s18 = sphi %s1805_s18, %s2080_s18   ;;  %s1725_s17 = sphi %s1803_s17, %s2079_s17  }
   0x4   : > { %s1468_s22 = sadd.s32 4294967294, %s1737_s20   ;;  %s1828_s23 = sadd.s32 1, %s1737_s20  }
   0x5   : > { %2072 = sst [smem:[#allocation6_spill]] %s1828_s23  ;;  %s277_s24 = sadd.s32 1, %s1733_s19 }
   0x6   : > { %s274_s25 = ssub.s32 %s1737_s20, %s1828_s23  ;;  %p287_p0 = scmp.ne.s32.totalorder %s1733_s19, %s1729_s18 }
   0x7   : > { %p275_p1 = scmp.eq.s32.totalorder %s274_s25, 0  ;;  %p288_p2 = scmp.eq.s32.totalorder %s1824_s21, 1 }
   0x8   : > { %p293_p3 = scmp.ne.s32.totalorder %s1729_s18, %s1725_s17  ;;  %p294_p4 = scmp.eq.s32.totalorder %s1468_s22, 1 }
   0x9   : > { %s1839_s26 = scalar_select %p275_p1, %s1733_s19, %s277_s24  }
   0xa   : > { %p1841_p5 = por %p288_p2, %p287_p0  ;;  %p1845_p6 = por %p294_p4, %p293_p3 }
   0xb   : > { %2073 = sst [smem:[#allocation7_spill]] %s1839_s26  ;;  %p1471_p7 = scmp.ge.s32.totalorder %s1737_s20, 1 }
   0xc   : > { %p357_p8 = scmp.lt.s32.totalorder %s1737_s20, 3 }
   0xe   : > { %p358_p9 = pnand %p1471_p7, %p357_p8 }
   0xf   : > { %p404_p10 = scmp.lt.s32.totalorder (!%p358_p9), %s1824_s21, 1  ;;  %s401_s30 = sand.u32 (!%p358_p9), 1, %s1729_s18  }
  0x10   : > { %361 = sbr.rel (%p358_p9) target bundleno = 1402 (0x57a), region = 64  ;;  %s1372_s24 = scalar_lea.sflag (!%p358_p9), [#allocation3], %s401_s30 }
  0x11   : > { %s1742_s25 = smov (!%p358_p9), [#allocation2]  }
  0x15   : > { %vm458_vm0 = vcmask 261120   ;;  %v1653_v0 = vld [vmem:[%s2059_s3] sm:$0xff]   ;;  %s405_s12 = scalar_select %p404_p10, %s1824_s21, 1  ;;  %v1739_v2 = vmov 0   ;;  %v426_v4 = vld [vmem:[%s2063_s7 + $0x10] sm:$0xff]  ;;  %v425_v7 = vld [vmem:[%s2063_s7 + $0x8] sm:$0xff] }
  0x16   : > { %v1654_v1 = vld [vmem:[%s2060_s4] sm:$0xff]   ;;  %1651 = vset.pattern.permute.xlu0 %v1739_v2  ;;  %1652 = vset.pattern.permute.xlu1 %v1739_v2  ;;  %v427_v10 = vld [vmem:[%s2063_s7 + $0x18] sm:$0xff]  ;;  %v1655_v12 = vld [vmem:[%s2059_s3 + $0x8] sm:$0xff]   ;;  %v1740_v18 = vmov 0.0   ;;  %vm853_vm1 = vcmask 1043456   ;;  %vm1741_vm2 = vmmov 0  }
  0x17   : > { %1534 = vmatprep.mubr.msk.bf16.mxu0 %vm458_vm0, %v1653_v0  ;;  %s1860_s15 = sshll.u32 %s405_s12, 2  ;;  %1540 = vmatprep.mubr.msk.bf16.mxu1 %vm458_vm0, %v1654_v1  ;;  %v424_v3 = vld [vmem:[%s2063_s7] sm:$0xff]  ;;  %v1656_v13 = vld [vmem:[%s2060_s4 + $0x8] sm:$0xff]   ;;  %v523_v15 = vld [vmem:[%s2064_s8 + $0x10] sm:$0xff]  ;;  %vm849_vm3 = vcmask 64512   ;;  %s1501_s12 = sshll.u32 %s1824_s21, 7 }
  0x18   : > { %s407_s29 = scalar_lea.vmem %s2056_s0, %s1860_s15  ;;  %s411_s14 = scalar_lea.vmem %s2057_s1, %s1860_s15  ;;  %430 = vperm.xlu0 %1651, %v424_v3   ;;  %440 = vperm.xlu1 %1652, %v426_v4   ;;  %v521_v11 = vld [vmem:[%s2064_s8] sm:$0xff]  ;;  %v522_v14 = vld [vmem:[%s2064_s8 + $0x8] sm:$0xff]  ;;  %v524_v16 = vld [vmem:[%s2064_s8 + $0x18] sm:$0xff] }
  0x19   : > { %v417_v5 = vld [vmem:[%s407_s29] sm:$0xf]  ;;  %s415_s23 = scalar_lea.vmem %s2058_s2, %s1860_s15  ;;  %v1658_v21 = vld [vmem:[%s2061_s5 + $0x8] sm:$0xff]   ;;  %s1472_s15 = sshll.u32 %s401_s30, 3 }
  0x1a   : > { %v418_v6 = vld [vmem:[%s411_s14] sm:$0xf]  ;;  %1606 = vmatprep.subr.msk.bf16.mxu0 %vm458_vm0, %v417_v5  ;;  %v466_v8 = vsel %vm458_vm0, %v417_v5, 0  ;;  %s403_s16 = scalar_lea.vmem [#allocation2], %s1472_s15  ;;  %s1681_s29 = sshll.u32 %s1742_s25, 4  ;;  %s1682_s29 = int_to_ptr.vmem [resolvable:$false] %s1681_s29 }
  0x1b   : > { %1607 = vmatprep.subr.msk.bf16.mxu1 %vm458_vm0, %v418_v6  ;;  %v562_v9 = vsel %vm458_vm0, %v418_v6, 0  ;;  %1533 = vmatpush3.bf16.xpose.msra.mxu0 %v466_v8  ;;  %v419_v17 = vld [vmem:[%s415_s23] sm:$0xf]  ;;  %s1385_s22 = sshll.u32 %s403_s16, 4  ;;  %s2014_s23 = scalar_lea.hbm %s2067_s11, %s1501_s12  ;;  %s2016_s22 = int_to_ptr.vmem [resolvable:$true] %s1385_s22 }
  0x1c   : > { %1539 = vmatpush3.bf16.xpose.msra.mxu1 %v562_v9  ;;  %435 = vperm.xlu0 %1651, %v425_v7   ;;  %v658_v19 = vsel %vm458_vm0, %v419_v17, 0  ;;  %v1657_v20 = vld [vmem:[%s2061_s5] sm:$0xff]   ;;  %s1677_s21 = scalar_lea.vmem %s2016_s22, 128  ;;  %s1683_s15 = scalar_lea.vmem %s1682_s29, 256 }
  0x1d   : > { %445 = vperm.xlu1 %1652, %v427_v10   ;;  %1608 = vmatprep.subr.msk.bf16.mxu0 %vm458_vm0, %v419_v17  ;;  %p1678_p11 = scmp.ne.s32.totalorder %s2016_s22, %s1677_s21  ;;  %p1684_p0 = scmp.lt.s32.totalorder %s2016_s22, %s1682_s29 }
  0x1e   : > { %1550 = vmatprep.subr.bf16.mxu1 %v1740_v18  ;;  %p1685_p1 = scmp.lt.s32.totalorder %s1683_s15, %s1677_s21 }
  0x1f   : > { %p1679_p12 = pnand %p1678_p11, %p1841_p5 }
  0x20   : > { %527 = vperm.xlu0 %1651, %v521_v11   ;;  %p1686_p2 = por %p1685_p1, %p1684_p0 }
  0x21   : > { %532 = vperm.xlu1 %1652, %v522_v14   ;;  %p1680_p13 = pneg %p1679_p12 }
  0x22   : > { %1535 = vmatmul.mubr.msk.bf16.vlgmr.msra.gmra.mxu0 %vm458_vm0, %v1655_v12 }
  0x23   : > { %1541 = vmatmul.mubr.msk.bf16.vlgmr.msra.gmra.mxu1 %vm458_vm0, %v1656_v13  ;;  %1545 = vmatpush3.bf16.xpose.msra.mxu0 %v658_v19  ;;  %p1687_p3 = pnand %p1686_p2, %p1680_p13 }
  0x24   : > { %537 = vperm.xlu0 %1651, %v523_v15   ;;  %1556 = vmatprep.subr.bf16.mxu0 %v1740_v18 }
  0x25   : > { %542 = vperm.xlu1 %1652, %v524_v16   ;;  %1546 = vmatprep.mubr.msk.bf16.mxu0 %vm458_vm0, %v1657_v20 }
  0x26   : > { %1552 = vmatprep.mubr.msk.bf16.mxu1 %vm1741_vm2, %v1740_v18 }
  0x2a   : > { %1547 = vmatmul.mubr.msk.bf16.vlgmr.msra.gmra.mxu0 %vm458_vm0, %v1658_v21 }
  0x2b   : > { %1558 = vmatprep.mubr.msk.bf16.mxu0 %vm1741_vm2, %v1740_v18 }
  0x93   : > { %v431_v22 = vpop.permute.xlu0 %430  ;;  %v441_v23 = vpop.permute.xlu1 %440 }
  0x97   : > { %v436_v24 = vpop.permute.xlu0 %435 }
  0x98   : > { %v446_v25 = vpop.permute.xlu1 %445 }
  0x9b   : > { %v528_v26 = vpop.permute.xlu0 %527 }
  0x9c   : > { %v533_v27 = vpop.permute.xlu1 %532 }
  0x9f   : > { %v538_v28 = vpop.permute.xlu0 %537 }
  0xa0   : > { %v543_v32 = vpop.permute.xlu1 %542 }
  0xe2   : > { %v1536_v29 = vpop.f32.mrf.mxu0 }
  0xe3   : > { %v1542_v30 = vpop.f32.mrf.mxu1  ;;  %v511_v43 = vadd.f32 %v1536_v29, %v441_v23  ;;  %v617_v23 = vld [vmem:[%s2065_s9] sm:$0xff] }
  0xe4   : > { %v607_v31 = vadd.f32 %v1542_v30, %v538_v28  ;;  %v502_v33 = vpop.f32.mrf.mxu0 }
  0xe5   : > { %v598_v34 = vpop.f32.mrf.mxu1  ;;  %v503_v36 = vadd.f32 %v502_v33, %v431_v22 }
  0xe6   : > { %v843_v35 = vpack.c.bf16 %v607_v31, %v607_v31  ;;  %v599_v37 = vadd.f32 %v598_v34, %v528_v26  ;;  %v1537_v38 = vpop.f32.mrf.mxu0 }
  0xe7   : > { %v1543_v39 = vpop.f32.mrf.mxu1  ;;  %709 = vxpose.xlu0.b32.start.end [1/1] (short) (narrow) %v503_v36, 8  ;;  %v514_v52 = vadd.f32 %v1537_v38, %v446_v25 }
  0xe8   : > { %v947_v40 = vsel %vm853_vm1, %v843_v35, 0  ;;  %v841_v41 = vpack.c.bf16 %v599_v37, %v599_v37  ;;  %v610_v42 = vadd.f32 %v1543_v39, %v543_v32  ;;  %v505_v44 = vpop.f32.mrf.mxu0 }
  0xe9   : > { %v601_v45 = vpop.f32.mrf.mxu1  ;;  %v506_v47 = vadd.f32 %v505_v44, %v436_v24  ;;  %v619_v44 = vld [vmem:[%s2065_s9 + $0x10] sm:$0xff] }
  0xea   : > { %v855_v46 = vsel %vm853_vm1, %v841_v41, 0  ;;  %v844_v48 = vpack.c.bf16 %v610_v42, %v610_v42  ;;  %v602_v49 = vadd.f32 %v601_v45, %v533_v27  ;;  %v1947_v62 = vpop.f32.mrf.mxu0  ;;  %v620_v45 = vld [vmem:[%s2065_s9 + $0x18] sm:$0xff] }
  0xeb   : > { %1551 = vmatpush3.bf16.msra.mxu1 %v855_v46  ;;  %741 = vxpose.xlu1.b32.start.end [1/1] (short) (narrow) %v506_v47, 8  ;;  %v618_v46 = vld [vmem:[%s2065_s9 + $0x8] sm:$0xff] }
  0xec   : > { %773 = vxpose.xlu0.b32.start.end [1/1] (short) (narrow) %v511_v43, 8  ;;  %v993_v50 = vsel %vm853_vm1, %v844_v48, 0  ;;  %v842_v51 = vpack.c.bf16 %v602_v49, %v602_v49  ;;  %1562 = vmatprep.subr.bf16.mxu1 %v1740_v18  ;;  %v1949_v63 = vpop.f32.mrf.mxu0 }
  0xee   : > { %v901_v53 = vsel %vm853_vm1, %v842_v51, 0  ;;  %v1951_v0 = vpop.f32.mrf.mxu0 }
  0xef   : > { %1557 = vmatpush3.bf16.msra.mxu0 %v901_v53 }
  0xf0   : > { %805 = vxpose.xlu0.b32.start.end [1/1] (short) (narrow) %v514_v52, 8  ;;  %1568 = vmatprep.subr.bf16.mxu0 %v1740_v18  ;;  %v1954_v3 = vpop.f32.mrf.mxu0 }
 0x163   : > { %v725_v54 = vpop.trf.xlu0 }
 0x164   : > { %v837_v55 = vpack.c.bf16 %v725_v54, %v725_v54 }
 0x166   : > { %1553 = vmatmul.mubr.msk.bf16.vlgmr.msra.gmra.mxu1 %vm849_vm3, %v837_v55 }
 0x167   : > { %1563 = vmatpush3.bf16.msra.mxu1 %v947_v40  ;;  %v757_v56 = vpop.trf.xlu1  ;;  %1564 = vmatprep.mubr.msk.bf16.mxu1 %vm1741_vm2, %v1740_v18 }
 0x168   : > { %v789_v57 = vpop.trf.xlu0  ;;  %v838_v58 = vpack.c.bf16 %v757_v56, %v757_v56  ;;  %1574 = vmatprep.subr.bf16.mxu1 %v1740_v18 }
 0x169   : > { %v839_v59 = vpack.c.bf16 %v789_v57, %v789_v57 }
 0x16a   : > { %1559 = vmatmul.mubr.msk.bf16.vlgmr.msra.gmra.mxu0 %vm849_vm3, %v838_v58 }
 0x16b   : > { %1569 = vmatpush3.bf16.msra.mxu0 %v993_v50  ;;  %1570 = vmatprep.mubr.msk.bf16.mxu0 %vm1741_vm2, %v1740_v18 }
 0x16c   : > { %v821_v60 = vpop.trf.xlu0  ;;  %1580 = vmatprep.subr.bf16.mxu0 %v1740_v18 }
 0x16d   : > { %v840_v61 = vpack.c.bf16 %v821_v60, %v821_v60 }
 0x16e   : > { %1565 = vmatmul.mubr.msk.bf16.vlgmr.msra.gmra.mxu1 %vm849_vm3, %v839_v59 }
 0x16f   : > { %1576 = vmatprep.mubr.msk.bf16.mxu1 %vm1741_vm2, %v1740_v18 }
 0x172   : > { %1571 = vmatmul.mubr.msk.bf16.vlgmr.msra.gmra.mxu0 %vm849_vm3, %v840_v61 }
 0x173   : > { %1582 = vmatprep.mubr.msk.bf16.mxu0 %vm1741_vm2, %v1740_v18 }
 0x226   : > { %v891_v1 = vpop.f32.mrf.mxu1 }
 0x227   : > { %v1035_v2 = vsel %vm849_vm3, %v891_v1, -inf }
 0x228   : > { %1036 = vmax.xlane.f32.xlu0 %v1035_v2  ;;  %v1554_v4 = vpop.f32.mrf.mxu1 }
 0x22a   : > { %v894_v5 = vpop.f32.mrf.mxu1  ;;  %v937_v6 = vpop.f32.mrf.mxu0 }
 0x22b   : > { %v1038_v7 = vsel %vm849_vm3, %v937_v6, -inf }
 0x22c   : > { %1039 = vmax.xlane.f32.xlu1 %v1038_v7  ;;  %v1555_v8 = vpop.f32.mrf.mxu1  ;;  %v1560_v9 = vpop.f32.mrf.mxu0 }
 0x22e   : > { %v940_v10 = vpop.f32.mrf.mxu0  ;;  %v983_v11 = vpop.f32.mrf.mxu1 }
 0x22f   : > { %v1041_v12 = vsel %vm849_vm3, %v983_v11, -inf }
 0x230   : > { %v1561_v13 = vpop.f32.mrf.mxu0  ;;  %1042 = vmax.xlane.f32.xlu1 %v1041_v12  ;;  %v1566_v14 = vpop.f32.mrf.mxu1 }
 0x232   : > { %v986_v15 = vpop.f32.mrf.mxu1  ;;  %v1029_v16 = vpop.f32.mrf.mxu0 }
 0x233   : > { %v1044_v17 = vsel %vm849_vm3, %v1029_v16, -inf }
 0x234   : > { %v1567_v19 = vpop.f32.mrf.mxu1  ;;  %1045 = vmax.xlane.f32.xlu0 %v1044_v17  ;;  %v1572_v20 = vpop.f32.mrf.mxu0 }
 0x236   : > { %v1032_v21 = vpop.f32.mrf.mxu0 }
 0x238   : > { %v1573_v22 = vpop.f32.mrf.mxu0 }
 0x241   : > { %623 = vperm.xlu1 %1652, %v617_v23  }
 0x2b1   : > { %v1037_v24 = vpop.xlane.xlu0 %1036 }
 0x2b2   : > { %v1047_v25 = vsub.f32 %v891_v1, %v1037_v24 }
 0x2b4   : > { %v1051_v26 = vmul.f32 1.442695, %v1047_v25 }
 0x2b5   : > { %v1040_v27 = vpop.xlane.xlu1 %1039 }
 0x2b6   : > { %1661 = vpow2.f32 %v1051_v26  ;;  %v1048_v28 = vsub.f32 %v937_v6, %v1040_v27 }
 0x2b8   : > { %v1053_v29 = vmul.f32 1.442695, %v1048_v28 }
 0x2b9   : > { %v1043_v30 = vpop.xlane.xlu1 %1042 }
 0x2ba   : > { %1663 = vpow2.f32 %v1053_v29  ;;  %v1049_v31 = vsub.f32 %v983_v11, %v1043_v30 }
 0x2bc   : > { %v1055_v32 = vmul.f32 1.442695, %v1049_v31 }
 0x2bd   : > { %v1046_v33 = vpop.xlane.xlu0 %1045  ;;  %v624_v47 = vpop.permute.xlu1 %623 }
 0x2be   : > { %1665 = vpow2.f32 %v1055_v32  ;;  %v1050_v34 = vsub.f32 %v1029_v16, %v1046_v33  ;;  %v695_v58 = vadd.f32 %v1949_v63, %v624_v47  ;;  %v1659_v16 = vld [vmem:[%s2062_s6 + $0x8] sm:$0xff]  }
 0x2bf   : > { %v1328_v17 = vsel %vm458_vm0, %v1659_v16, 0 }
 0x2c0   : > { %v1057_v35 = vmul.f32 1.442695, %v1050_v34  ;;  %v845_v5 = vpack.c.bf16 %v695_v58, %v695_v58 }
 0x2c2   : > { %1667 = vpow2.f32 %v1057_v35 }
 0x2c3   : > { %v1662_v36 = vpop.eup %1661 }
 0x2c4   : > { %v1059_v37 = vsel %vm849_vm3, %v1662_v36, 0.0 }
 0x2c5   : > { %1060 = vadd.xlane.f32.xlu1 %v1059_v37  ;;  %v1496_v37 = vld [vmem:[%s2066_s10] ss:$0 sm:$0xff] }
 0x2c7   : > { %v1664_v38 = vpop.eup %1663 }
 0x2c8   : > { %v1062_v39 = vsel %vm849_vm3, %v1664_v38, 0.0 }
 0x2c9   : > { %1063 = vadd.xlane.f32.xlu0 %v1062_v39 }
 0x2cb   : > { %v1666_v40 = vpop.eup %1665 }
 0x2cc   : > { %v1065_v41 = vsel %vm849_vm3, %v1666_v40, 0.0 }
 0x2cd   : > { %1066 = vadd.xlane.f32.xlu1 %v1065_v41 }
 0x2cf   : > { %v1668_v42 = vpop.eup %1667 }
 0x2d0   : > { %v1068_v43 = vsel %vm849_vm3, %v1668_v42, 0.0 }
 0x2d1   : > { %1069 = vadd.xlane.f32.xlu0 %v1068_v43 }
 0x2de   : > { %633 = vperm.xlu1 %1652, %v619_v44  }
 0x2e2   : > { %638 = vperm.xlu1 %1652, %v620_v45  }
 0x2e7   : > { %628 = vperm.xlu0 %1651, %v618_v46  }
 0x34e   : > { %v1061_v48 = vpop.xlane.xlu1 %1060 }
 0x34f   : > { %1669 = vrcp.f32 %v1061_v48 }
 0x352   : > { %v1064_v49 = vpop.xlane.xlu0 %1063 }
 0x353   : > { %1671 = vrcp.f32 %v1064_v49 }
 0x356   : > { %v1067_v50 = vpop.xlane.xlu1 %1066 }
 0x357   : > { %1673 = vrcp.f32 %v1067_v50 }
 0x35a   : > { %v1070_v51 = vpop.xlane.xlu0 %1069  ;;  %v634_v4 = vpop.permute.xlu1 %633 }
 0x35b   : > { %1675 = vrcp.f32 %v1070_v51  ;;  %v703_v10 = vadd.f32 %v1947_v62, %v634_v4 }
 0x35c   : > { %v1670_v52 = vpop.eup %1669 }
 0x35d   : > { %v1072_v53 = vmul.f32 %v1670_v52, %v1662_v36  ;;  %v847_v14 = vpack.c.bf16 %v703_v10, %v703_v10 }
 0x35f   : > { %v1079_v54 = vpack.c.bf16 %v1072_v53, %v1072_v53 }
 0x360   : > { %v1672_v55 = vpop.eup %1671 }
 0x361   : > { %v1087_v56 = vsel %vm849_vm3, %v1079_v54, 0  ;;  %v1074_v57 = vmul.f32 %v1672_v55, %v1664_v38 }
 0x362   : > { %1575 = vmatpush3.bf16.xpose.msra.mxu1 %v1087_v56  ;;  %v629_v61 = vpop.permute.xlu0 %628 }
 0x363   : > { %v1080_v59 = vpack.c.bf16 %v1074_v57, %v1074_v57  ;;  %1586 = vmatprep.subr.bf16.mxu1 %v1740_v18  ;;  %v698_v6 = vadd.f32 %v1954_v3, %v629_v61  ;;  %v639_v3 = vpop.permute.xlu1 %638 }
 0x364   : > { %v1674_v60 = vpop.eup %1673  ;;  %v706_v15 = vadd.f32 %v1951_v0, %v639_v3  ;;  %v1660_v0 = vld [vmem:[%s2062_s6] sm:$0xff]  }
 0x365   : > { %v1133_v1 = vsel %vm849_vm3, %v1080_v59, 0  ;;  %v1076_v2 = vmul.f32 %v1674_v60, %v1666_v40  ;;  %v846_v11 = vpack.c.bf16 %v698_v6, %v698_v6  ;;  %v1325_v19 = vsel %vm458_vm0, %v1660_v0, 0 }
 0x366   : > { %1581 = vmatpush3.bf16.xpose.msra.mxu0 %v1133_v1  ;;  %v848_v62 = vpack.c.bf16 %v706_v15, %v706_v15 }
 0x367   : > { %v1081_v7 = vpack.c.bf16 %v1076_v2, %v1076_v2  ;;  %1592 = vmatprep.subr.bf16.mxu0 %v1740_v18 }
 0x368   : > { %v1676_v8 = vpop.eup %1675 }
 0x369   : > { %1577 = vmatmul.mubr.msk.bf16.vlgmr.msra.gmra.mxu1 %vm849_vm3, %v845_v5  ;;  %v1179_v63 = vsel %vm849_vm3, %v1081_v7, 0  ;;  %v1078_v9 = vmul.f32 %v1676_v8, %v1668_v42 }
 0x36a   : > { %1587 = vmatpush3.bf16.xpose.msra.mxu1 %v1179_v63  ;;  %1588 = vmatprep.mubr.msk.bf16.mxu1 %vm1741_vm2, %v1740_v18 }
 0x36b   : > { %v1082_v12 = vpack.c.bf16 %v1078_v9, %v1078_v9  ;;  %1598 = vmatprep.subr.bf16.mxu1 %v1740_v18 }
 0x36d   : > { %1583 = vmatmul.mubr.msk.bf16.vlgmr.msra.gmra.mxu0 %vm849_vm3, %v846_v11  ;;  %v1225_v13 = vsel %vm849_vm3, %v1082_v12, 0 }
 0x36e   : > { %1593 = vmatpush3.bf16.xpose.msra.mxu0 %v1225_v13  ;;  %1594 = vmatprep.mubr.msk.bf16.mxu0 %vm1741_vm2, %v1740_v18 }
 0x371   : > { %1589 = vmatmul.mubr.msk.bf16.vlgmr.msra.gmra.mxu1 %vm849_vm3, %v847_v14 }
 0x372   : > { %1602 = vmatprep.mubr.msk.bf16.mxu1 %vm1741_vm2, %v1740_v18  ;;  %1599 = vmatpush3.bf16.xpose.msra.mxu1 %v1328_v17 }
 0x373   : > { %1600 = vmatprep.subr.bf16.mxu1 %v1740_v18 }
 0x375   : > { %1595 = vmatmul.mubr.msk.bf16.vlgmr.msra.gmra.mxu0 %vm849_vm3, %v848_v62 }
 0x37a   : > { %1601 = vmatpush3.bf16.xpose.msra.mxu1 %v1325_v19 }
 0x429   : > { %v1123_v20 = vpop.f32.mrf.mxu1 }
 0x42a   : > { %1267 = vxpose.xlu0.b32.start [1/4] (short) (narrow) %v1123_v20, 8 }
 0x42b   : > { %v1578_v21 = vpop.f32.mrf.mxu1 }
 0x42d   : > { %v1126_v22 = vpop.f32.mrf.mxu1  ;;  %v1169_v23 = vpop.f32.mrf.mxu0 }
 0x42e   : > { %1268 = vxpose.xlu0.b32.cont [2/4] (short) (narrow) %v1169_v23, 8 }
 0x42f   : > { %v1579_v24 = vpop.f32.mrf.mxu1  ;;  %v1584_v25 = vpop.f32.mrf.mxu0 }
 0x431   : > { %v1172_v26 = vpop.f32.mrf.mxu0  ;;  %v1215_v27 = vpop.f32.mrf.mxu1 }
 0x432   : > { %1269 = vxpose.xlu0.b32.cont [3/4] (short) (narrow) %v1215_v27, 8 }
 0x433   : > { %v1585_v18 = vpop.f32.mrf.mxu0  ;;  %v1590_v28 = vpop.f32.mrf.mxu1 }
 0x435   : > { %v1218_v29 = vpop.f32.mrf.mxu1  ;;  %v1261_v30 = vpop.f32.mrf.mxu0 }
 0x436   : > { %1270 = vxpose.xlu0.b32.end [4/4] (short) (narrow) %v1261_v30, 8 }
 0x437   : > { %v1591_v31 = vpop.f32.mrf.mxu1  ;;  %v1596_v32 = vpop.f32.mrf.mxu0 }
 0x439   : > { %v1264_v33 = vpop.f32.mrf.mxu0 }
 0x43b   : > { %v1597_v34 = vpop.f32.mrf.mxu0 }
 0x4a6   : > { %v1283_v35 = vpop.trf.xlu0 }
 0x4a7   : > { %v1299_v36 = vpack.c.bf16 %v1283_v35, %v1283_v35 }
 0x4a9   : > { %1603 = vmatmul.mubr.msk.bf16.vlgmr.msra.gmra.mxu1 %vm458_vm0, %v1299_v36 }
 0x569   : > { %v1364_v38 = vpop.f32.mrf.mxu1 }
 0x56a   : > { %v1365_v39 = vadd.f32 %v1496_v37, %v1364_v38 }
 0x56b   : > { %v1604_v40 = vpop.f32.mrf.mxu1 }
 0x56c   : > { %1370 = vst.msk [vmem:[%s403_s16] sm:$0xff] %vm458_vm0, %v1365_v39 }
 0x56d   : > { %v1367_v41 = vpop.f32.mrf.mxu1 }
 0x56e   : > { %1690 = shalt.err (!%p1687_p3)
}
 0x56f   : > { %s1691_s13 = scalar_lea.hbm %s2014_s23, 128  ;;  %s1695_s12 = scalar_lea.hbm %s2067_s11, 256 }
 0x570   : > { %p1692_p4 = scmp.ne.s32.totalorder %s2014_s23, %s1691_s13  ;;  %p1696_p9 = scmp.lt.s32.totalorder %s2014_s23, %s2067_s11 }
 0x571   : > { %p1697_p10 = scmp.lt.s32.totalorder %s1695_s12, %s1691_s13 }
 0x572   : > { %p1693_p7 = pnand %p1692_p4, %p1841_p5 }
 0x573   : > { %p1698_p11 = por %p1697_p10, %p1696_p9 }
 0x574   : > { %p1694_p8 = pneg %p1693_p7 }
 0x576   : > { %p1699_p12 = pnand %p1698_p11, %p1694_p8 }
 0x578   : > { %1702 = shalt.err (!%p1699_p12)
}
 0x579   : > { %1609 = dma.vmem_to_hbm [thread:$0]  (%p1841_p5), %s2016_s22, 128, %s2014_s23, %s1372_s24   ;;  %v1605_v42 = vpop.f32.mrf.mxu1 }
 0x57a PF: > { %p1615_p13 = scmp.ge.s32.totalorder %s1737_s20, 2  ;;  %s1397_s19 = sand.u32 1, %s1725_s17  }
 0x57b   : > { %s1398_s21 = scalar_lea.sflag [#allocation3], %s1397_s19 }
 0x57c   : > { %p1612_p0 = pnand %p1615_p13, %p1845_p6 }
 0x57e   : > { %p1613_p1 = pneg %p1612_p0 }
 0x580   : > { %1720 = dma.done.wait (%p1613_p1), %s1398_s21, 128  }
 0x581   : > { %1722 = vsyncadd (%p1613_p1), %s1398_s21, 4294967168  ;;  %s2076_s20 = sld [smem:[#allocation6_spill]]  ;;  %s2079_s17 = smov %s1729_s18 }
 0x582   : > { %s2077_s25 = sld [smem:[#allocation5_spill]] }
 0x583   : > { %s2078_s19 = sld [smem:[#allocation7_spill]] }
 0x587   : > { %p21_p2 = scmp.ge.s32.totalorder %s2076_s20, 4  }
 0x588   : > { %s2080_s18 = smov %s2077_s25 }
 0x589   :  { %23 = sbr.rel (!%p21_p2) target bundleno = 3 (0x3), region = 105 }
 0x58e   :  { %1403 = vsyncpa [#allocation3], 1 }
 0x58f   :  { %1405 = vsyncpa [#allocation3 + $0x1], 1 }

</bundles_post_ra>
